<compile_context>
chip_gen: v7x
topology: tpu7x:2x2x1
jax: 0.10.0
libtpu: 0.0.40
codegen_flags: <defaults>
</compile_context>

<pallas_src>
import math

import jax
import jax.numpy as jnp
from jax import lax
from jax.experimental import pallas as pl
from jax.experimental.pallas import tpu as pltpu

# ----------------------- model hyper-parameters (small) -----------------------
T = 8              # number of time steps (x.size(0))
B = 8              # seq_size in the module == x.size(1) ("batch" of the LSTM)
Z_DIM = 8          # z_dim
D_IN = Z_DIM + 3   # fc1 input features
HIDDEN_DIM = 32    # hidden_dim (fc1 out / LSTM in)
HIDDEN_UNITS = 32  # hidden_units (LSTM hidden size)
N_GAUSS = 4        # n_gaussians
GZ = N_GAUSS * Z_DIM          # 32
OUT_PAD = 128                 # lane-dense fused output width (3*GZ=96 -> 128)
TEMPERATURE = 1.15
SQRT_TEMP = TEMPERATURE ** 0.5


# --------------------------------- kernel -------------------------------------
def lstm_mdn_kernel(
    x_ref,                      # (T*B, D_IN)
    w1_ref, b1_ref,             # (D_IN, HD), (1, HD)
    wih_ref, bg_ref,            # (HD, 4H),   (1, 4H)   g-block pre-scaled x2
    whh_ref,                    # (H, 4H)               g-block pre-scaled x2
    wheads_ref, bheads_ref,     # (H, 128),   (1, 128)  cols = [pi|mu|sigma|0pad]
    smat_ref,                   # (GZ, GZ) 0/1 "same z" selector for group sums
    out_ref,                    # (T*B, 128)            cols = [pi|mu|sigma|pad]
    hs_ref,                     # scratch: (T*B, H) f32
):
    H = HIDDEN_UNITS
    f32 = jnp.float32

    # ---- batched, non-recurrent matmuls (hoisted out of the time loop) ----
    x_all = x_ref[...]                                                  # (T*B, D_IN)
    a_all = jnp.maximum(
        jnp.dot(x_all, w1_ref[...], preferred_element_type=f32) + b1_ref[...],
        0.0,
    )                                                                   # (T*B, HD)
    g_in = (
        jnp.dot(a_all, wih_ref[...], preferred_element_type=f32) + bg_ref[...]
    )                                                                   # (T*B, 4H)

    whh = whh_ref[...]                                                  # (H, 4H)

    # ---- serial LSTM recurrence (PyTorch gate order i, f, g, o), unrolled ----
    h = jnp.zeros((B, H), f32)    # self.hidden = (zeros, zeros) in the module
    c = jnp.zeros((B, H), f32)
    for t in range(T):
        gates = g_in[t * B:(t + 1) * B, :] + jnp.dot(
            h, whh, preferred_element_type=f32)                         # (B, 4H)
        # one full-width 128-lane sigmoid covers i, f, o AND (scaled) g:
        # tanh(x) = 2*sigmoid(2x) - 1, with the 2x folded into the weights.
        sig = jax.nn.sigmoid(gates)
        i_g = sig[:, 0 * H:1 * H]
        f_g = sig[:, 1 * H:2 * H]
        g_g = 2.0 * sig[:, 2 * H:3 * H] - 1.0
        o_g = sig[:, 3 * H:4 * H]
        c = f_g * c + i_g * g_g
        h = o_g * jnp.tanh(c)
        hs_ref[t * B:(t + 1) * B, :] = h                                # spill to slab

    hs_all = hs_ref[...]                                                # (T*B, H)

    # ---- batched output heads: one (T*B, H) x (H, 128) matmul, lane-dense ----
    heads = (
        jnp.dot(hs_all, wheads_ref[...], preferred_element_type=f32)
        + bheads_ref[...]
    )                                                                   # (T*B, 128)
    pi_logits = heads[:, 0:GZ]
    mu_out = heads[:, GZ:2 * GZ]
    sig_logits = heads[:, 2 * GZ:3 * GZ]

    # pi: softmax over the gaussian axis (stride-Z_DIM lane groups), then /temp.
    # Shift by the per-row max (softmax is shift-invariant per row); the per-z
    # group sums come from one tiny 0/1 selector matmul on the idle MXU, which
    # also broadcasts the denominator back to every lane of its group.
    m = jnp.max(pi_logits, axis=1, keepdims=True)                       # (T*B, 1)
    e = jnp.exp(pi_logits - m)                                          # (T*B, GZ)
    denom = jnp.dot(e, smat_ref[...], preferred_element_type=f32)       # (T*B, GZ)
    pi_out = e * pl.reciprocal(denom * TEMPERATURE, approx=False)       # fold 1/temp

    # sigma: exp(.) * sqrt(temperature)
    sigma_out = jnp.exp(sig_logits) * SQRT_TEMP                         # (T*B, GZ)

    # single 128-lane unmasked full-width store
    out_ref[...] = jnp.concatenate(
        [pi_out, mu_out, sigma_out, jnp.zeros_like(mu_out)], axis=1)


# --------------------------------- wrapper ------------------------------------
def lstm_mdn_forward(x, params):
    """x: (T, B, D_IN) float32.  Returns (pi, sigma, mu), each (T, B, G, Z)."""
    (w1t, b1, wiht, bih, whht, bhh,
     wpit, bpi, wmut, bmu, wsigt, bsig) = params
    H = HIDDEN_UNITS

    x2 = x.reshape(T * B, D_IN)

    # Parameter packing (glue, exact):
    #  * fold bih + bhh,
    #  * pre-scale the g-gate columns by 2 (power of two -> bit-exact) so the
    #    in-kernel tanh rides the same sigmoid EUP push,
    #  * fuse + zero-pad the three head weights to 128 output lanes.
    gate_scale = jnp.concatenate(
        [jnp.ones((2 * H,), jnp.float32),
         jnp.full((H,), 2.0, jnp.float32),
         jnp.ones((H,), jnp.float32)])                          # (4H,)
    wih_s = wiht * gate_scale[None, :]                          # (HD, 4H)
    whh_s = whht * gate_scale[None, :]                          # (H, 4H)
    b_gates = (bih + bhh) * gate_scale[None, :]                 # (1, 4H)

    pad = OUT_PAD - 3 * GZ
    w_heads = jnp.concatenate(
        [wpit, wmut, wsigt, jnp.zeros((H, pad), jnp.float32)], axis=1)   # (H, 128)
    b_heads = jnp.concatenate(
        [bpi, bmu, bsig, jnp.zeros((1, pad), jnp.float32)], axis=1)      # (1, 128)

    # 0/1 selector: smat[i, j] = 1 iff lanes i, j share the same z (i%Z == j%Z)
    idx = jnp.arange(GZ)
    smat = (idx[:, None] % Z_DIM == idx[None, :] % Z_DIM).astype(jnp.float32)

    vmem = pl.BlockSpec(memory_space=pltpu.MemorySpace.VMEM)
    out = pl.pallas_call(
        lstm_mdn_kernel,
        out_shape=jax.ShapeDtypeStruct((T * B, OUT_PAD), jnp.float32),
        in_specs=[vmem] * 9,
        out_specs=vmem,
        scratch_shapes=[pltpu.VMEM((T * B, HIDDEN_UNITS), jnp.float32)],
        compiler_params=pltpu.CompilerParams(vmem_limit_bytes=2 * 1024 * 1024),
    )(x2, w1t, b1, wih_s, b_gates, whh_s, w_heads, b_heads, smat)

    pi = out[:, 0:GZ].reshape(T, B, N_GAUSS, Z_DIM)
    mu = out[:, GZ:2 * GZ].reshape(T, B, N_GAUSS, Z_DIM)
    sigma = out[:, 2 * GZ:3 * GZ].reshape(T, B, N_GAUSS, Z_DIM)
    return pi, sigma, mu


# ------------------------------ pure-JAX reference -----------------------------
def lstm_mdn_reference(x, params):
    (w1t, b1, wiht, bih, whht, bhh,
     wpit, bpi, wmut, bmu, wsigt, bsig) = params
    H = HIDDEN_UNITS
    a = jax.nn.relu(x @ w1t + b1)                          # (T, B, HD)

    def step(carry, a_t):
        h, c = carry
        gates = a_t @ wiht + bih + h @ whht + bhh
        i_g = jax.nn.sigmoid(gates[:, 0 * H:1 * H])
        f_g = jax.nn.sigmoid(gates[:, 1 * H:2 * H])
        g_g = jnp.tanh(gates[:, 2 * H:3 * H])
        o_g = jax.nn.sigmoid(gates[:, 3 * H:4 * H])
        c = f_g * c + i_g * g_g
        h = o_g * jnp.tanh(c)
        return (h, c), h

    h0 = jnp.zeros((B, H), jnp.float32)
    c0 = jnp.zeros((B, H), jnp.float32)
    _, z = lax.scan(step, (h0, c0), a)                     # (T, B, H)

    pi = jax.nn.softmax((z @ wpit + bpi).reshape(T, B, N_GAUSS, Z_DIM), axis=2)
    pi = pi / TEMPERATURE
    mu = (z @ wmut + bmu).reshape(T, B, N_GAUSS, Z_DIM)
    sigma = jnp.exp(z @ wsigt + bsig).reshape(T, B, N_GAUSS, Z_DIM) * SQRT_TEMP
    return pi, sigma, mu


# ---------------------------------- main ---------------------------------------
def make_params(key):
    """Deterministic parameter init (PyTorch-style uniform(-k, k))."""
    def lin(key, fan_in, fan_out):
        k = 1.0 / math.sqrt(fan_in)
        kw, kb = jax.random.split(key)
        # stored pre-transposed: (in, out); bias as (1, out) for in-kernel broadcast
        w = jax.random.uniform(kw, (fan_in, fan_out), jnp.float32, -k, k)
        b = jax.random.uniform(kb, (1, fan_out), jnp.float32, -k, k)
        return w, b

    keys = jax.random.split(key, 6)
    w1t, b1 = lin(keys[0], D_IN, HIDDEN_DIM)                    # fc1
    wiht, bih = lin(keys[1], HIDDEN_DIM, 4 * HIDDEN_UNITS)      # lstm weight_ih_l0
    whht, bhh = lin(keys[2], HIDDEN_UNITS, 4 * HIDDEN_UNITS)    # lstm weight_hh_l0
    wpit, bpi = lin(keys[3], HIDDEN_UNITS, GZ)                  # pi
    wmut, bmu = lin(keys[4], HIDDEN_UNITS, GZ)                  # mu
    wsigt, bsig = lin(keys[5], HIDDEN_UNITS, GZ)                # sigma
    return (w1t, b1, wiht, bih, whht, bhh, wpit, bpi, wmut, bmu, wsigt, bsig)


if __name__ == "__main__":
    key = jax.random.PRNGKey(0)
    kx, kp = jax.random.split(key)
    x = jax.random.normal(kx, (T, B, D_IN), jnp.float32)   # (seq_len, seq_size, z_dim+3)
    params = make_params(kp)

    pi, sigma, mu = jax.block_until_ready(
        jax.jit(lstm_mdn_forward)(x, params)
    )

    pi_r, sigma_r, mu_r = lstm_mdn_reference(x, params)
    assert pi.shape == (T, B, N_GAUSS, Z_DIM)
    assert sigma.shape == (T, B, N_GAUSS, Z_DIM)
    assert mu.shape == (T, B, N_GAUSS, Z_DIM)
    assert jnp.allclose(pi, pi_r, atol=1e-5, rtol=1e-5)
    assert jnp.allclose(sigma, sigma_r, atol=1e-5, rtol=1e-5)
    assert jnp.allclose(mu, mu_r, atol=1e-5, rtol=1e-5)

    print("KERNEL_OK")
</pallas_src>

<mosaic_0001>
module attributes {stable_mosaic.version = 11 : i64} {
  func.func @lstm_mdn_kernel(%arg0: memref<64x11xf32, #tpu.memory_space<vmem>>, %arg1: memref<11x32xf32, #tpu.memory_space<vmem>>, %arg2: memref<1x32xf32, #tpu.memory_space<vmem>>, %arg3: memref<32x128xf32, #tpu.memory_space<vmem>>, %arg4: memref<1x128xf32, #tpu.memory_space<vmem>>, %arg5: memref<32x128xf32, #tpu.memory_space<vmem>>, %arg6: memref<32x128xf32, #tpu.memory_space<vmem>>, %arg7: memref<1x128xf32, #tpu.memory_space<vmem>>, %arg8: memref<32x32xf32, #tpu.memory_space<vmem>>, %arg9: memref<64x128xf32, #tpu.memory_space<vmem>>, %arg10: memref<64x32xf32, #tpu.memory_space<vmem>>) attributes {dimension_semantics = [], scalar_prefetch = 0 : i64, scratch_operands = 1 : i64, tpu.core_type = #tpu.core_type<tc>} {
    %c0 = arith.constant 0 : index
    %c0_0 = arith.constant 0 : index
    %0 = vector.load %arg0[%c0, %c0_0] : memref<64x11xf32, #tpu.memory_space<vmem>>, vector<64x11xf32>
    %c0_1 = arith.constant 0 : index
    %c0_2 = arith.constant 0 : index
    %1 = vector.load %arg1[%c0_1, %c0_2] : memref<11x32xf32, #tpu.memory_space<vmem>>, vector<11x32xf32>
    %cst = arith.constant dense<0.000000e+00> : vector<64x32xf32>
    %2 = tpu.matmul %0, %1, %cst {dimension_numbers = #tpu.dot_dimension_numbers<[1], [0], [0], [1], [0, 0, 1, 1], [], []>} : vector<64x11xf32>, vector<11x32xf32>, vector<64x32xf32> -> vector<64x32xf32>
    %c0_3 = arith.constant 0 : index
    %c0_4 = arith.constant 0 : index
    %3 = vector.load %arg2[%c0_3, %c0_4] : memref<1x32xf32, #tpu.memory_space<vmem>>, vector<1x32xf32>
    %4 = vector.broadcast %3 : vector<1x32xf32> to vector<64x32xf32>
    %5 = arith.addf %2, %4 : vector<64x32xf32>
    %cst_5 = arith.constant 0.000000e+00 : f32
    %6 = vector.broadcast %cst_5 : f32 to vector<64x32xf32>
    %7 = arith.maximumf %5, %6 : vector<64x32xf32>
    %c0_6 = arith.constant 0 : index
    %c0_7 = arith.constant 0 : index
    %8 = vector.load %arg3[%c0_6, %c0_7] : memref<32x128xf32, #tpu.memory_space<vmem>>, vector<32x128xf32>
    %cst_8 = arith.constant dense<0.000000e+00> : vector<64x128xf32>
    %9 = tpu.matmul %7, %8, %cst_8 {dimension_numbers = #tpu.dot_dimension_numbers<[1], [0], [0], [1], [0, 0, 1, 1], [], []>} : vector<64x32xf32>, vector<32x128xf32>, vector<64x128xf32> -> vector<64x128xf32>
    %c0_9 = arith.constant 0 : index
    %c0_10 = arith.constant 0 : index
    %10 = vector.load %arg4[%c0_9, %c0_10] : memref<1x128xf32, #tpu.memory_space<vmem>>, vector<1x128xf32>
    %11 = vector.broadcast %10 : vector<1x128xf32> to vector<64x128xf32>
    %12 = arith.addf %9, %11 : vector<64x128xf32>
    %c0_11 = arith.constant 0 : index
    %c0_12 = arith.constant 0 : index
    %13 = vector.load %arg5[%c0_11, %c0_12] : memref<32x128xf32, #tpu.memory_space<vmem>>, vector<32x128xf32>
    %cst_13 = arith.constant 0.000000e+00 : f32
    %14 = vector.broadcast %cst_13 : f32 to vector<8x32xf32>
    %cst_14 = arith.constant 0.000000e+00 : f32
    %15 = vector.broadcast %cst_14 : f32 to vector<8x32xf32>
    %16 = vector.extract_strided_slice %12 {offsets = [0, 0], sizes = [8, 128], strides = [1, 1]} : vector<64x128xf32> to vector<8x128xf32>
    %cst_15 = arith.constant dense<0.000000e+00> : vector<8x128xf32>
    %17 = tpu.matmul %14, %13, %cst_15 {dimension_numbers = #tpu.dot_dimension_numbers<[1], [0], [0], [1], [0, 0, 1, 1], [], []>} : vector<8x32xf32>, vector<32x128xf32>, vector<8x128xf32> -> vector<8x128xf32>
    %18 = arith.addf %16, %17 : vector<8x128xf32>
    %19 = arith.negf %18 : vector<8x128xf32>
    %20 = math.exp %19 : vector<8x128xf32>
    %cst_16 = arith.constant 1.000000e+00 : f32
    %21 = vector.broadcast %cst_16 : f32 to vector<8x128xf32>
    %22 = arith.addf %21, %20 : vector<8x128xf32>
    %23 = arith.divf %21, %22 : vector<8x128xf32>
    %24 = vector.extract_strided_slice %23 {offsets = [0, 0], sizes = [8, 32], strides = [1, 1]} : vector<8x128xf32> to vector<8x32xf32>
    %25 = vector.extract_strided_slice %23 {offsets = [0, 32], sizes = [8, 32], strides = [1, 1]} : vector<8x128xf32> to vector<8x32xf32>
    %26 = vector.extract_strided_slice %23 {offsets = [0, 64], sizes = [8, 32], strides = [1, 1]} : vector<8x128xf32> to vector<8x32xf32>
    %cst_17 = arith.constant 2.000000e+00 : f32
    %27 = vector.broadcast %cst_17 : f32 to vector<8x32xf32>
    %28 = arith.mulf %27, %26 : vector<8x32xf32>
    %cst_18 = arith.constant 1.000000e+00 : f32
    %29 = vector.broadcast %cst_18 : f32 to vector<8x32xf32>
    %30 = arith.subf %28, %29 : vector<8x32xf32>
    %31 = vector.extract_strided_slice %23 {offsets = [0, 96], sizes = [8, 32], strides = [1, 1]} : vector<8x128xf32> to vector<8x32xf32>
    %32 = arith.mulf %25, %15 : vector<8x32xf32>
    %33 = arith.mulf %24, %30 : vector<8x32xf32>
    %34 = arith.addf %32, %33 : vector<8x32xf32>
    %35 = math.tanh %34 : vector<8x32xf32>
    %36 = arith.mulf %31, %35 : vector<8x32xf32>
    %c0_19 = arith.constant 0 : index
    %c0_20 = arith.constant 0 : index
    %37 = vector.load %arg10[%c0_19, %c0_20] : memref<64x32xf32, #tpu.memory_space<vmem>>, vector<8x32xf32>
    tpu.vector_store %arg10[%c0_19, %c0_20], %36 {strides = array<i32>} : memref<64x32xf32, #tpu.memory_space<vmem>>, vector<8x32xf32>,
    %38 = vector.extract_strided_slice %12 {offsets = [8, 0], sizes = [8, 128], strides = [1, 1]} : vector<64x128xf32> to vector<8x128xf32>
    %cst_21 = arith.constant dense<0.000000e+00> : vector<8x128xf32>
    %39 = tpu.matmul %36, %13, %cst_21 {dimension_numbers = #tpu.dot_dimension_numbers<[1], [0], [0], [1], [0, 0, 1, 1], [], []>} : vector<8x32xf32>, vector<32x128xf32>, vector<8x128xf32> -> vector<8x128xf32>
    %40 = arith.addf %38, %39 : vector<8x128xf32>
    %41 = arith.negf %40 : vector<8x128xf32>
    %42 = math.exp %41 : vector<8x128xf32>
    %cst_22 = arith.constant 1.000000e+00 : f32
    %43 = vector.broadcast %cst_22 : f32 to vector<8x128xf32>
    %44 = arith.addf %43, %42 : vector<8x128xf32>
    %45 = arith.divf %43, %44 : vector<8x128xf32>
    %46 = vector.extract_strided_slice %45 {offsets = [0, 0], sizes = [8, 32], strides = [1, 1]} : vector<8x128xf32> to vector<8x32xf32>
    %47 = vector.extract_strided_slice %45 {offsets = [0, 32], sizes = [8, 32], strides = [1, 1]} : vector<8x128xf32> to vector<8x32xf32>
    %48 = vector.extract_strided_slice %45 {offsets = [0, 64], sizes = [8, 32], strides = [1, 1]} : vector<8x128xf32> to vector<8x32xf32>
    %cst_23 = arith.constant 2.000000e+00 : f32
    %49 = vector.broadcast %cst_23 : f32 to vector<8x32xf32>
    %50 = arith.mulf %49, %48 : vector<8x32xf32>
    %cst_24 = arith.constant 1.000000e+00 : f32
    %51 = vector.broadcast %cst_24 : f32 to vector<8x32xf32>
    %52 = arith.subf %50, %51 : vector<8x32xf32>
    %53 = vector.extract_strided_slice %45 {offsets = [0, 96], sizes = [8, 32], strides = [1, 1]} : vector<8x128xf32> to vector<8x32xf32>
    %54 = arith.mulf %47, %34 : vector<8x32xf32>
    %55 = arith.mulf %46, %52 : vector<8x32xf32>
    %56 = arith.addf %54, %55 : vector<8x32xf32>
    %57 = math.tanh %56 : vector<8x32xf32>
    %58 = arith.mulf %53, %57 : vector<8x32xf32>
    %c8 = arith.constant 8 : index
    %c0_25 = arith.constant 0 : index
    %59 = vector.load %arg10[%c8, %c0_25] : memref<64x32xf32, #tpu.memory_space<vmem>>, vector<8x32xf32>
    tpu.vector_store %arg10[%c8, %c0_25], %58 {strides = array<i32>} : memref<64x32xf32, #tpu.memory_space<vmem>>, vector<8x32xf32>,
    %60 = vector.extract_strided_slice %12 {offsets = [16, 0], sizes = [8, 128], strides = [1, 1]} : vector<64x128xf32> to vector<8x128xf32>
    %cst_26 = arith.constant dense<0.000000e+00> : vector<8x128xf32>
    %61 = tpu.matmul %58, %13, %cst_26 {dimension_numbers = #tpu.dot_dimension_numbers<[1], [0], [0], [1], [0, 0, 1, 1], [], []>} : vector<8x32xf32>, vector<32x128xf32>, vector<8x128xf32> -> vector<8x128xf32>
    %62 = arith.addf %60, %61 : vector<8x128xf32>
    %63 = arith.negf %62 : vector<8x128xf32>
    %64 = math.exp %63 : vector<8x128xf32>
    %cst_27 = arith.constant 1.000000e+00 : f32
    %65 = vector.broadcast %cst_27 : f32 to vector<8x128xf32>
    %66 = arith.addf %65, %64 : vector<8x128xf32>
    %67 = arith.divf %65, %66 : vector<8x128xf32>
    %68 = vector.extract_strided_slice %67 {offsets = [0, 0], sizes = [8, 32], strides = [1, 1]} : vector<8x128xf32> to vector<8x32xf32>
    %69 = vector.extract_strided_slice %67 {offsets = [0, 32], sizes = [8, 32], strides = [1, 1]} : vector<8x128xf32> to vector<8x32xf32>
    %70 = vector.extract_strided_slice %67 {offsets = [0, 64], sizes = [8, 32], strides = [1, 1]} : vector<8x128xf32> to vector<8x32xf32>
    %cst_28 = arith.constant 2.000000e+00 : f32
    %71 = vector.broadcast %cst_28 : f32 to vector<8x32xf32>
    %72 = arith.mulf %71, %70 : vector<8x32xf32>
    %cst_29 = arith.constant 1.000000e+00 : f32
    %73 = vector.broadcast %cst_29 : f32 to vector<8x32xf32>
    %74 = arith.subf %72, %73 : vector<8x32xf32>
    %75 = vector.extract_strided_slice %67 {offsets = [0, 96], sizes = [8, 32], strides = [1, 1]} : vector<8x128xf32> to vector<8x32xf32>
    %76 = arith.mulf %69, %56 : vector<8x32xf32>
    %77 = arith.mulf %68, %74 : vector<8x32xf32>
    %78 = arith.addf %76, %77 : vector<8x32xf32>
    %79 = math.tanh %78 : vector<8x32xf32>
    %80 = arith.mulf %75, %79 : vector<8x32xf32>
    %c16 = arith.constant 16 : index
    %c0_30 = arith.constant 0 : index
    %81 = vector.load %arg10[%c16, %c0_30] : memref<64x32xf32, #tpu.memory_space<vmem>>, vector<8x32xf32>
    tpu.vector_store %arg10[%c16, %c0_30], %80 {strides = array<i32>} : memref<64x32xf32, #tpu.memory_space<vmem>>, vector<8x32xf32>,
    %82 = vector.extract_strided_slice %12 {offsets = [24, 0], sizes = [8, 128], strides = [1, 1]} : vector<64x128xf32> to vector<8x128xf32>
    %cst_31 = arith.constant dense<0.000000e+00> : vector<8x128xf32>
    %83 = tpu.matmul %80, %13, %cst_31 {dimension_numbers = #tpu.dot_dimension_numbers<[1], [0], [0], [1], [0, 0, 1, 1], [], []>} : vector<8x32xf32>, vector<32x128xf32>, vector<8x128xf32> -> vector<8x128xf32>
    %84 = arith.addf %82, %83 : vector<8x128xf32>
    %85 = arith.negf %84 : vector<8x128xf32>
    %86 = math.exp %85 : vector<8x128xf32>
    %cst_32 = arith.constant 1.000000e+00 : f32
    %87 = vector.broadcast %cst_32 : f32 to vector<8x128xf32>
    %88 = arith.addf %87, %86 : vector<8x128xf32>
    %89 = arith.divf %87, %88 : vector<8x128xf32>
    %90 = vector.extract_strided_slice %89 {offsets = [0, 0], sizes = [8, 32], strides = [1, 1]} : vector<8x128xf32> to vector<8x32xf32>
    %91 = vector.extract_strided_slice %89 {offsets = [0, 32], sizes = [8, 32], strides = [1, 1]} : vector<8x128xf32> to vector<8x32xf32>
    %92 = vector.extract_strided_slice %89 {offsets = [0, 64], sizes = [8, 32], strides = [1, 1]} : vector<8x128xf32> to vector<8x32xf32>
    %cst_33 = arith.constant 2.000000e+00 : f32
    %93 = vector.broadcast %cst_33 : f32 to vector<8x32xf32>
    %94 = arith.mulf %93, %92 : vector<8x32xf32>
    %cst_34 = arith.constant 1.000000e+00 : f32
    %95 = vector.broadcast %cst_34 : f32 to vector<8x32xf32>
    %96 = arith.subf %94, %95 : vector<8x32xf32>
    %97 = vector.extract_strided_slice %89 {offsets = [0, 96], sizes = [8, 32], strides = [1, 1]} : vector<8x128xf32> to vector<8x32xf32>
    %98 = arith.mulf %91, %78 : vector<8x32xf32>
    %99 = arith.mulf %90, %96 : vector<8x32xf32>
    %100 = arith.addf %98, %99 : vector<8x32xf32>
    %101 = math.tanh %100 : vector<8x32xf32>
    %102 = arith.mulf %97, %101 : vector<8x32xf32>
    %c24 = arith.constant 24 : index
    %c0_35 = arith.constant 0 : index
    %103 = vector.load %arg10[%c24, %c0_35] : memref<64x32xf32, #tpu.memory_space<vmem>>, vector<8x32xf32>
    tpu.vector_store %arg10[%c24, %c0_35], %102 {strides = array<i32>} : memref<64x32xf32, #tpu.memory_space<vmem>>, vector<8x32xf32>,
    %104 = vector.extract_strided_slice %12 {offsets = [32, 0], sizes = [8, 128], strides = [1, 1]} : vector<64x128xf32> to vector<8x128xf32>
    %cst_36 = arith.constant dense<0.000000e+00> : vector<8x128xf32>
    %105 = tpu.matmul %102, %13, %cst_36 {dimension_numbers = #tpu.dot_dimension_numbers<[1], [0], [0], [1], [0, 0, 1, 1], [], []>} : vector<8x32xf32>, vector<32x128xf32>, vector<8x128xf32> -> vector<8x128xf32>
    %106 = arith.addf %104, %105 : vector<8x128xf32>
    %107 = arith.negf %106 : vector<8x128xf32>
    %108 = math.exp %107 : vector<8x128xf32>
    %cst_37 = arith.constant 1.000000e+00 : f32
    %109 = vector.broadcast %cst_37 : f32 to vector<8x128xf32>
    %110 = arith.addf %109, %108 : vector<8x128xf32>
    %111 = arith.divf %109, %110 : vector<8x128xf32>
    %112 = vector.extract_strided_slice %111 {offsets = [0, 0], sizes = [8, 32], strides = [1, 1]} : vector<8x128xf32> to vector<8x32xf32>
    %113 = vector.extract_strided_slice %111 {offsets = [0, 32], sizes = [8, 32], strides = [1, 1]} : vector<8x128xf32> to vector<8x32xf32>
    %114 = vector.extract_strided_slice %111 {offsets = [0, 64], sizes = [8, 32], strides = [1, 1]} : vector<8x128xf32> to vector<8x32xf32>
    %cst_38 = arith.constant 2.000000e+00 : f32
    %115 = vector.broadcast %cst_38 : f32 to vector<8x32xf32>
    %116 = arith.mulf %115, %114 : vector<8x32xf32>
    %cst_39 = arith.constant 1.000000e+00 : f32
    %117 = vector.broadcast %cst_39 : f32 to vector<8x32xf32>
    %118 = arith.subf %116, %117 : vector<8x32xf32>
    %119 = vector.extract_strided_slice %111 {offsets = [0, 96], sizes = [8, 32], strides = [1, 1]} : vector<8x128xf32> to vector<8x32xf32>
    %120 = arith.mulf %113, %100 : vector<8x32xf32>
    %121 = arith.mulf %112, %118 : vector<8x32xf32>
    %122 = arith.addf %120, %121 : vector<8x32xf32>
    %123 = math.tanh %122 : vector<8x32xf32>
    %124 = arith.mulf %119, %123 : vector<8x32xf32>
    %c32 = arith.constant 32 : index
    %c0_40 = arith.constant 0 : index
    %125 = vector.load %arg10[%c32, %c0_40] : memref<64x32xf32, #tpu.memory_space<vmem>>, vector<8x32xf32>
    tpu.vector_store %arg10[%c32, %c0_40], %124 {strides = array<i32>} : memref<64x32xf32, #tpu.memory_space<vmem>>, vector<8x32xf32>,
    %126 = vector.extract_strided_slice %12 {offsets = [40, 0], sizes = [8, 128], strides = [1, 1]} : vector<64x128xf32> to vector<8x128xf32>
    %cst_41 = arith.constant dense<0.000000e+00> : vector<8x128xf32>
    %127 = tpu.matmul %124, %13, %cst_41 {dimension_numbers = #tpu.dot_dimension_numbers<[1], [0], [0], [1], [0, 0, 1, 1], [], []>} : vector<8x32xf32>, vector<32x128xf32>, vector<8x128xf32> -> vector<8x128xf32>
    %128 = arith.addf %126, %127 : vector<8x128xf32>
    %129 = arith.negf %128 : vector<8x128xf32>
    %130 = math.exp %129 : vector<8x128xf32>
    %cst_42 = arith.constant 1.000000e+00 : f32
    %131 = vector.broadcast %cst_42 : f32 to vector<8x128xf32>
    %132 = arith.addf %131, %130 : vector<8x128xf32>
    %133 = arith.divf %131, %132 : vector<8x128xf32>
    %134 = vector.extract_strided_slice %133 {offsets = [0, 0], sizes = [8, 32], strides = [1, 1]} : vector<8x128xf32> to vector<8x32xf32>
    %135 = vector.extract_strided_slice %133 {offsets = [0, 32], sizes = [8, 32], strides = [1, 1]} : vector<8x128xf32> to vector<8x32xf32>
    %136 = vector.extract_strided_slice %133 {offsets = [0, 64], sizes = [8, 32], strides = [1, 1]} : vector<8x128xf32> to vector<8x32xf32>
    %cst_43 = arith.constant 2.000000e+00 : f32
    %137 = vector.broadcast %cst_43 : f32 to vector<8x32xf32>
    %138 = arith.mulf %137, %136 : vector<8x32xf32>
    %cst_44 = arith.constant 1.000000e+00 : f32
    %139 = vector.broadcast %cst_44 : f32 to vector<8x32xf32>
    %140 = arith.subf %138, %139 : vector<8x32xf32>
    %141 = vector.extract_strided_slice %133 {offsets = [0, 96], sizes = [8, 32], strides = [1, 1]} : vector<8x128xf32> to vector<8x32xf32>
    %142 = arith.mulf %135, %122 : vector<8x32xf32>
    %143 = arith.mulf %134, %140 : vector<8x32xf32>
    %144 = arith.addf %142, %143 : vector<8x32xf32>
    %145 = math.tanh %144 : vector<8x32xf32>
    %146 = arith.mulf %141, %145 : vector<8x32xf32>
    %c40 = arith.constant 40 : index
    %c0_45 = arith.constant 0 : index
    %147 = vector.load %arg10[%c40, %c0_45] : memref<64x32xf32, #tpu.memory_space<vmem>>, vector<8x32xf32>
    tpu.vector_store %arg10[%c40, %c0_45], %146 {strides = array<i32>} : memref<64x32xf32, #tpu.memory_space<vmem>>, vector<8x32xf32>,
    %148 = vector.extract_strided_slice %12 {offsets = [48, 0], sizes = [8, 128], strides = [1, 1]} : vector<64x128xf32> to vector<8x128xf32>
    %cst_46 = arith.constant dense<0.000000e+00> : vector<8x128xf32>
    %149 = tpu.matmul %146, %13, %cst_46 {dimension_numbers = #tpu.dot_dimension_numbers<[1], [0], [0], [1], [0, 0, 1, 1], [], []>} : vector<8x32xf32>, vector<32x128xf32>, vector<8x128xf32> -> vector<8x128xf32>
    %150 = arith.addf %148, %149 : vector<8x128xf32>
    %151 = arith.negf %150 : vector<8x128xf32>
    %152 = math.exp %151 : vector<8x128xf32>
    %cst_47 = arith.constant 1.000000e+00 : f32
    %153 = vector.broadcast %cst_47 : f32 to vector<8x128xf32>
    %154 = arith.addf %153, %152 : vector<8x128xf32>
    %155 = arith.divf %153, %154 : vector<8x128xf32>
    %156 = vector.extract_strided_slice %155 {offsets = [0, 0], sizes = [8, 32], strides = [1, 1]} : vector<8x128xf32> to vector<8x32xf32>
    %157 = vector.extract_strided_slice %155 {offsets = [0, 32], sizes = [8, 32], strides = [1, 1]} : vector<8x128xf32> to vector<8x32xf32>
    %158 = vector.extract_strided_slice %155 {offsets = [0, 64], sizes = [8, 32], strides = [1, 1]} : vector<8x128xf32> to vector<8x32xf32>
    %cst_48 = arith.constant 2.000000e+00 : f32
    %159 = vector.broadcast %cst_48 : f32 to vector<8x32xf32>
    %160 = arith.mulf %159, %158 : vector<8x32xf32>
    %cst_49 = arith.constant 1.000000e+00 : f32
    %161 = vector.broadcast %cst_49 : f32 to vector<8x32xf32>
    %162 = arith.subf %160, %161 : vector<8x32xf32>
    %163 = vector.extract_strided_slice %155 {offsets = [0, 96], sizes = [8, 32], strides = [1, 1]} : vector<8x128xf32> to vector<8x32xf32>
    %164 = arith.mulf %157, %144 : vector<8x32xf32>
    %165 = arith.mulf %156, %162 : vector<8x32xf32>
    %166 = arith.addf %164, %165 : vector<8x32xf32>
    %167 = math.tanh %166 : vector<8x32xf32>
    %168 = arith.mulf %163, %167 : vector<8x32xf32>
    %c48 = arith.constant 48 : index
    %c0_50 = arith.constant 0 : index
    %169 = vector.load %arg10[%c48, %c0_50] : memref<64x32xf32, #tpu.memory_space<vmem>>, vector<8x32xf32>
    tpu.vector_store %arg10[%c48, %c0_50], %168 {strides = array<i32>} : memref<64x32xf32, #tpu.memory_space<vmem>>, vector<8x32xf32>,
    %170 = vector.extract_strided_slice %12 {offsets = [56, 0], sizes = [8, 128], strides = [1, 1]} : vector<64x128xf32> to vector<8x128xf32>
    %cst_51 = arith.constant dense<0.000000e+00> : vector<8x128xf32>
    %171 = tpu.matmul %168, %13, %cst_51 {dimension_numbers = #tpu.dot_dimension_numbers<[1], [0], [0], [1], [0, 0, 1, 1], [], []>} : vector<8x32xf32>, vector<32x128xf32>, vector<8x128xf32> -> vector<8x128xf32>
    %172 = arith.addf %170, %171 : vector<8x128xf32>
    %173 = arith.negf %172 : vector<8x128xf32>
    %174 = math.exp %173 : vector<8x128xf32>
    %cst_52 = arith.constant 1.000000e+00 : f32
    %175 = vector.broadcast %cst_52 : f32 to vector<8x128xf32>
    %176 = arith.addf %175, %174 : vector<8x128xf32>
    %177 = arith.divf %175, %176 : vector<8x128xf32>
    %178 = vector.extract_strided_slice %177 {offsets = [0, 0], sizes = [8, 32], strides = [1, 1]} : vector<8x128xf32> to vector<8x32xf32>
    %179 = vector.extract_strided_slice %177 {offsets = [0, 32], sizes = [8, 32], strides = [1, 1]} : vector<8x128xf32> to vector<8x32xf32>
    %180 = vector.extract_strided_slice %177 {offsets = [0, 64], sizes = [8, 32], strides = [1, 1]} : vector<8x128xf32> to vector<8x32xf32>
    %cst_53 = arith.constant 2.000000e+00 : f32
    %181 = vector.broadcast %cst_53 : f32 to vector<8x32xf32>
    %182 = arith.mulf %181, %180 : vector<8x32xf32>
    %cst_54 = arith.constant 1.000000e+00 : f32
    %183 = vector.broadcast %cst_54 : f32 to vector<8x32xf32>
    %184 = arith.subf %182, %183 : vector<8x32xf32>
    %185 = vector.extract_strided_slice %177 {offsets = [0, 96], sizes = [8, 32], strides = [1, 1]} : vector<8x128xf32> to vector<8x32xf32>
    %186 = arith.mulf %179, %166 : vector<8x32xf32>
    %187 = arith.mulf %178, %184 : vector<8x32xf32>
    %188 = arith.addf %186, %187 : vector<8x32xf32>
    %189 = math.tanh %188 : vector<8x32xf32>
    %190 = arith.mulf %185, %189 : vector<8x32xf32>
    %c56 = arith.constant 56 : index
    %c0_55 = arith.constant 0 : index
    %191 = vector.load %arg10[%c56, %c0_55] : memref<64x32xf32, #tpu.memory_space<vmem>>, vector<8x32xf32>
    tpu.vector_store %arg10[%c56, %c0_55], %190 {strides = array<i32>} : memref<64x32xf32, #tpu.memory_space<vmem>>, vector<8x32xf32>,
    %c0_56 = arith.constant 0 : index
    %c0_57 = arith.constant 0 : index
    %192 = vector.load %arg10[%c0_56, %c0_57] : memref<64x32xf32, #tpu.memory_space<vmem>>, vector<64x32xf32>
    %c0_58 = arith.constant 0 : index
    %c0_59 = arith.constant 0 : index
    %193 = vector.load %arg6[%c0_58, %c0_59] : memref<32x128xf32, #tpu.memory_space<vmem>>, vector<32x128xf32>
    %cst_60 = arith.constant dense<0.000000e+00> : vector<64x128xf32>
    %194 = tpu.matmul %192, %193, %cst_60 {dimension_numbers = #tpu.dot_dimension_numbers<[1], [0], [0], [1], [0, 0, 1, 1], [], []>} : vector<64x32xf32>, vector<32x128xf32>, vector<64x128xf32> -> vector<64x128xf32>
    %c0_61 = arith.constant 0 : index
    %c0_62 = arith.constant 0 : index
    %195 = vector.load %arg7[%c0_61, %c0_62] : memref<1x128xf32, #tpu.memory_space<vmem>>, vector<1x128xf32>
    %196 = vector.broadcast %195 : vector<1x128xf32> to vector<64x128xf32>
    %197 = arith.addf %194, %196 : vector<64x128xf32>
    %198 = vector.extract_strided_slice %197 {offsets = [0, 0], sizes = [64, 32], strides = [1, 1]} : vector<64x128xf32> to vector<64x32xf32>
    %199 = vector.extract_strided_slice %197 {offsets = [0, 32], sizes = [64, 32], strides = [1, 1]} : vector<64x128xf32> to vector<64x32xf32>
    %200 = vector.extract_strided_slice %197 {offsets = [0, 64], sizes = [64, 32], strides = [1, 1]} : vector<64x128xf32> to vector<64x32xf32>
    %cst_63 = arith.constant dense<0xFF800000> : vector<64xf32>
    %201 = vector.multi_reduction <maximumf>, %198, %cst_63 [1] : vector<64x32xf32> to vector<64xf32>
    %202 = vector.shape_cast %201 : vector<64xf32> to vector<64x1xf32>
    %203 = vector.broadcast %202 : vector<64x1xf32> to vector<64x32xf32>
    %204 = arith.subf %198, %203 : vector<64x32xf32>
    %205 = math.exp %204 : vector<64x32xf32>
    %c0_64 = arith.constant 0 : index
    %c0_65 = arith.constant 0 : index
    %206 = vector.load %arg8[%c0_64, %c0_65] : memref<32x32xf32, #tpu.memory_space<vmem>>, vector<32x32xf32>
    %cst_66 = arith.constant dense<0.000000e+00> : vector<64x32xf32>
    %207 = tpu.matmul %205, %206, %cst_66 {dimension_numbers = #tpu.dot_dimension_numbers<[1], [0], [0], [1], [0, 0, 1, 1], [], []>} : vector<64x32xf32>, vector<32x32xf32>, vector<64x32xf32> -> vector<64x32xf32>
    %cst_67 = arith.constant 1.150000e+00 : f32
    %208 = vector.broadcast %cst_67 : f32 to vector<64x32xf32>
    %209 = arith.mulf %207, %208 : vector<64x32xf32>
    %210 = tpu.reciprocal %209 : vector<64x32xf32> -> vector<64x32xf32>
    %211 = arith.mulf %205, %210 : vector<64x32xf32>
    %212 = math.exp %200 : vector<64x32xf32>
    %cst_68 = arith.constant 1.07238054 : f32
    %213 = vector.broadcast %cst_68 : f32 to vector<64x32xf32>
    %214 = arith.mulf %212, %213 : vector<64x32xf32>
    %cst_69 = arith.constant 0.000000e+00 : f32
    %215 = vector.broadcast %cst_69 : f32 to vector<64x32xf32>
    %216 = tpu.concatenate %211, %199, %214, %215 in 1 : vector<64x32xf32>, vector<64x32xf32>, vector<64x32xf32>, vector<64x32xf32> -> vector<64x128xf32>
    %c0_70 = arith.constant 0 : index
    %c0_71 = arith.constant 0 : index
    %217 = vector.load %arg9[%c0_70, %c0_71] : memref<64x128xf32, #tpu.memory_space<vmem>>, vector<64x128xf32>
    tpu.vector_store %arg9[%c0_70, %c0_71], %216 {strides = array<i32>} : memref<64x128xf32, #tpu.memory_space<vmem>>, vector<64x128xf32>,
    return
  }
}

</mosaic_0001>

<bundles_post_ra>
// kernel: lstm_mdn_forward.1
= control target key start
LH: loop header
LB: loop body
LE: loop exit
PB: predicated region body
PF: predicated region fallthrough
CT: control target
= control target key end

     0   :  { %vm74_vm0 = vcmask 1042432   ;;  %vm49_vm1 = vcmask 89088   ;;  %vm2065_vm2 = vmmov 1   ;;  %v2066_v10 = vmov 0.0|0.0   ;;  %s2070_s22 = smov 32   ;;  %s2508_s1 = inlined_call_operand.vmem [shape: f32[11,32], index: 1, kind: input, shape index: {}]   ;;  %s2509_s0 = inlined_call_operand.vmem [shape: f32[64,11], index: 0, kind: input, shape index: {}]   ;;  %s2510_s5 = inlined_call_operand.vmem [shape: f32[32,128], index: 5, kind: input, shape index: {}]   ;;  %s2511_s3 = inlined_call_operand.vmem [shape: f32[32,128], index: 3, kind: input, shape index: {}]   ;;  %s2512_s2 = inlined_call_operand.vmem [shape: f32[1,32], index: 2, kind: input, shape index: {}]   ;;  %s2513_s4 = inlined_call_operand.vmem [shape: f32[1,128], index: 4, kind: input, shape index: {}]   ;;  %s2514_s6 = inlined_call_operand.vmem [shape: f32[32,128], index: 6, kind: input, shape index: {}]   ;;  %s2515_s7 = inlined_call_operand.vmem [shape: f32[1,128], index: 7, kind: input, shape index: {}]   ;;  %s2516_s8 = inlined_call_operand.vmem [shape: f32[32,32], index: 8, kind: input, shape index: {}]   ;;  %s2517_s9 = inlined_call_operand.vmem [shape: f32[64,128], index: 9, kind: output, shape index: {}]  }
   0x1   :  { %v40_v0 = vld [vmem:[%s2508_s1] sm:$0xff]  ;;  %v41_v1 = vld [vmem:[%s2508_s1 + $0x8] sm:$0x7]  ;;  %vm1886_vm3 = vmpackc.low %vm74_vm0, %vm2065_vm2  ;;  %vm2067_vm4 = vmmov 0   ;;  %v2068_v24 = vmov 0.0   ;;  %vm202_vm5 = vcmask 261120  }
   0x2   :  { %v1885_v2 = vpack.c.bf16 %v41_v1, %v40_v0  ;;  %v32_v3 = vld [vmem:[%s2509_s0] sm:$0xff]  ;;  %v333_v5 = vld [vmem:[%s2510_s5 + $0x8] sm:$0xff]  ;;  %v34_v11 = vld [vmem:[%s2509_s0 + $0x10] sm:$0xff]  ;;  %vm1546_vm6 = vcmask 523264   ;;  %vm1555_vm7 = vcmask 785408  }
   0x3   :  { %1725 = vmatprep.mubr.msk.f32.mxu0 %vm49_vm1, %v32_v3  ;;  %v332_v4 = vld [vmem:[%s2510_s5] sm:$0xff]  ;;  %v33_v7 = vld [vmem:[%s2509_s0 + $0x8] sm:$0xff]  ;;  %v35_v13 = vld [vmem:[%s2509_s0 + $0x18] sm:$0xff] }
   0x4   :  { %1887 = vmatprep.subr.msk.bf16.mxu0 %vm1886_vm3, %v1885_v2  ;;  %v191_v6 = vld [vmem:[%s2511_s3] sm:$0xff]  ;;  %v2143_v8 = vpack.c.bf16 %v333_v5, %v332_v4  ;;  %v192_v9 = vld [vmem:[%s2511_s3 + $0x8] sm:$0xff]  ;;  %v193_v16 = vld [vmem:[%s2511_s3 + $0x10] sm:$0xff] }
   0x5   :  { %1890 = vmatpush3.bf16.msk.msra.mxu0 %vm1886_vm3, %v1885_v2  ;;  %v1891_v12 = vpack.c.bf16 %v192_v9, %v191_v6  ;;  %v36_v14 = vld [vmem:[%s2509_s0 + $0x20] sm:$0xff]  ;;  %v37_v15 = vld [vmem:[%s2509_s0 + $0x28] sm:$0xff]  ;;  %v194_v17 = vld [vmem:[%s2511_s3 + $0x18] sm:$0xff] }
   0x6   :  { %1899 = vmatprep.subr.bf16.mxu0 %v2066_v10  ;;  %v38_v18 = vld [vmem:[%s2509_s0 + $0x30] sm:$0xff]  ;;  %v1895_v19 = vpack.c.bf16 %v194_v17, %v193_v16  ;;  %v39_v20 = vld [vmem:[%s2509_s0 + $0x38] sm:$0xff]  ;;  %v1576_v25 = vld [vmem:[%s2512_s2] ss:$0 sm:$0xff] }
   0x7   :  { %1892 = vmatprep.subr.bf16.mxu1 %v1891_v12  ;;  %v334_v21 = vld [vmem:[%s2510_s5 + $0x10] sm:$0xff]  ;;  %v335_v22 = vld [vmem:[%s2510_s5 + $0x18] sm:$0xff]  ;;  %v2222_v52 = vld [vmem:[%s2513_s4] ss:$0 sm:$0xff]  ;;  %s2069_s4 = smov 64  }
   0x8   :  { %1726 = vmatmul.mubr.msk.f32.vlgmr.msra.gmra.mrb[0].mxu0 %vm49_vm1, %v33_v7  ;;  %1894 = vmatpush3.bf16.msra.mxu1 %v1891_v12  ;;  %v2188_v23 = vpack.c.bf16 %v335_v22, %v334_v21 }
   0x9   :  { %1728 = vmatprep.mubr.msk.f32.mxu0 %vm49_vm1, %v34_v11  ;;  %1901 = vmatpush3.bf16.msra.mxu0 %v2143_v8 }
   0xa   :  { %1902 = vmatprep.subr.bf16.mxu0 %v2066_v10  ;;  %1896 = vmatprep.subr.bf16.mxu1 %v1895_v19 }
   0xc   :  { %1729 = vmatmul.mubr.msk.f32.gmra.mrb[2].mxu0 %vm49_vm1, %v35_v13  ;;  %1898 = vmatpush3.bf16.msra.mxu1 %v1895_v19 }
   0xd   :  { %1731 = vmatprep.mubr.msk.f32.mxu0 %vm49_vm1, %v36_v14  ;;  %1905 = vmatprep.subr.bf16.mxu1 %v2066_v10 }
   0xe   :  { %1904 = vmatpush3.bf16.msra.mxu0 %v2188_v23 }
   0xf   :  { %1911 = vmatprep.subr.bf16.mxu0 %v2066_v10 }
  0x10   :  { %1732 = vmatmul.mubr.msk.f32.gmra.mrb[4].mxu0 %vm49_vm1, %v37_v15 }
  0x11   :  { %1734 = vmatprep.mubr.msk.f32.mxu0 %vm49_vm1, %v38_v18 }
  0x14   :  { %1735 = vmatmul.mubr.msk.f32.gmra.mrb[6].mxu0 %vm49_vm1, %v39_v20 }
  0x15   :  { %1765 = vmatprep.mubr.msk.f32.mxu0 %vm2067_vm4, %v2068_v24 }
  0x18   :  { %1766 = vmatmul.mubr.f32.vlgmr.msra.gmra.mrb[8].mxu0 %v2068_v24 }
  0x19   :  { %1913 = vmatpush3.bf16.msra.mxu0 %v2143_v8  ;;  %1787 = vmatprep.mubr.msk.f32.mxu0 %vm2067_vm4, %v2068_v24 }
  0x1a   :  { %1914 = vmatprep.subr.bf16.mxu0 %v2066_v10 }
  0x1d   :  { %1916 = vmatpush3.bf16.msra.mxu0 %v2188_v23 }
  0x1e   :  { %1923 = vmatprep.subr.bf16.mxu0 %v2066_v10 }
  0xdb   :  { %v1727_v26 = vpop.f32.mrb[0].mxu0 }
  0xdc   :  { %v150_v27 = vadd.f32 %v1727_v26, %v1576_v25  ;;  %v144_v28 = vpop.f32.mrb[1].mxu0 }
  0xdd   :  { %v145_v29 = vadd.f32 %v1576_v25, %v144_v28 }
  0xde   :  { %v184_v32 = vmax.f32 %v150_v27, 0.0 }
  0xdf   :  { %v183_v30 = vmax.f32 %v145_v29, 0.0  ;;  %v1730_v31 = vpop.f32.mrb[2].mxu0 }
  0xe0   :  { %v160_v33 = vadd.f32 %v1730_v31, %v1576_v25  ;;  %v154_v34 = vpop.f32.mrb[3].mxu0 }
  0xe1   :  { %1745 = vmatprep.mubr.msk.f32.mxu1 %vm202_vm5, %v183_v30  ;;  %v155_v35 = vadd.f32 %v1576_v25, %v154_v34 }
  0xe2   :  { %1746 = vmatmul.mubr.msk.f32.vlgmr.msra.gmra.mrb[0].mxu1 %vm202_vm5, %v184_v32  ;;  %v186_v36 = vmax.f32 %v160_v33, 0.0 }
  0xe3   :  { %v185_v37 = vmax.f32 %v155_v35, 0.0  ;;  %v1733_v38 = vpop.f32.mrb[4].mxu0  ;;  %1907 = vmatpush3.bf16.msra.mxu1 %v2143_v8 }
  0xe4   :  { %v170_v39 = vadd.f32 %v1733_v38, %v1576_v25  ;;  %v164_v40 = vpop.f32.mrb[5].mxu0  ;;  %1908 = vmatprep.subr.bf16.mxu1 %v2066_v10 }
  0xe5   :  { %v165_v41 = vadd.f32 %v1576_v25, %v164_v40  ;;  %1748 = vmatprep.mubr.msk.f32.mxu1 %vm202_vm5, %v185_v37 }
  0xe6   :  { %v188_v42 = vmax.f32 %v170_v39, 0.0  ;;  %1749 = vmatmul.mubr.msk.f32.gmra.mrb[2].mxu1 %vm202_vm5, %v186_v36 }
  0xe7   :  { %v187_v43 = vmax.f32 %v165_v41, 0.0  ;;  %1910 = vmatpush3.bf16.msra.mxu1 %v2188_v23  ;;  %v1736_v44 = vpop.f32.mrb[6].mxu0 }
  0xe8   :  { %1917 = vmatprep.subr.bf16.mxu1 %v2066_v10  ;;  %v180_v45 = vadd.f32 %v1736_v44, %v1576_v25  ;;  %v174_v46 = vpop.f32.mrb[7].mxu0 }
  0xe9   :  { %1751 = vmatprep.mubr.msk.f32.mxu1 %vm202_vm5, %v187_v43  ;;  %v175_v47 = vadd.f32 %v1576_v25, %v174_v46 }
  0xea   :  { %1752 = vmatmul.mubr.msk.f32.gmra.mrb[4].mxu1 %vm202_vm5, %v188_v42  ;;  %v190_v48 = vmax.f32 %v180_v45, 0.0 }
  0xeb   :  { %v189_v49 = vmax.f32 %v175_v47, 0.0  ;;  %v405_v50 = vpop.f32.mrb[8].mxu0 }
  0xec   :  { %v1767_v51 = vpop.f32.mrb[9].mxu0 }
  0xed   :  { %1754 = vmatprep.mubr.msk.f32.mxu1 %vm202_vm5, %v189_v49 }
  0xee   :  { %1755 = vmatmul.mubr.msk.f32.gmra.mrb[6].mxu1 %vm202_vm5, %v190_v48 }
  0xef   :  { %1776 = vmatprep.mubr.msk.f32.mxu1 %vm2067_vm4, %v2068_v24 }
 0x1b5   :  { %v1747_v53 = vpop.f32.mrb[0].mxu1 }
 0x1b6   :  { %v293_v54 = vpop.f32.mrb[1].mxu1  ;;  %v299_v16 = vadd.f32 %v1747_v53, %v2222_v52 }
 0x1b7   :  { %v294_v55 = vadd.f32 %v2222_v52, %v293_v54 }
 0x1b9   :  { %v409_v56 = vadd.f32 %v405_v50, %v294_v55  ;;  %v2225_v60 = vpop.f32.mrb[2].mxu1 }
 0x1ba   :  { %v2227_v61 = vpop.f32.mrb[3].mxu1 }
 0x1bb   :  { %v1595_v57 = vmul.f32 -1.442695, %v409_v56  ;;  %v304_v37 = vadd.f32 %v2222_v52, %v2227_v61 }
 0x1bd   :  { %1969 = vpow2.f32 %v1595_v57  ;;  %v2229_v62 = vpop.f32.mrb[4].mxu1  ;;  %v309_v57 = vadd.f32 %v2225_v60, %v2222_v52 }
 0x1be   :  { %v2231_v63 = vpop.f32.mrb[5].mxu1 }
 0x1c1   :  { %v2234_v3 = vpop.f32.mrb[6].mxu1 }
 0x1c2   :  { %v2236_v4 = vpop.f32.mrb[7].mxu1 }
 0x1c7   :  { %v1970_v58 = vpop.eup %1969 }
 0x1c8   :  { %v413_v59 = vadd.f32 1.0, %v1970_v58 }
 0x1ca   :  { %1971 = vrcp.f32 %v413_v59 }
 0x1d4   :  { %v1972_v0 = vpop.eup %1971 }
 0x1d5   :  { %v416_v1 = vmul.f32 2.0, %v1972_v0  ;;  %v418_v7 = vmul.f32 0.0, %v1972_v0 }
 0x1d7   :  { %v1596_v2 = vadd.f32 -1.0, %v416_v1 }
 0x1d9   :  { %420 = vrot.lane.b32.xlu0 %v1596_v2, %s2069_s4 }
 0x24b   :  { %v421_v5 = vpop.permute.xlu0 %420 }
 0x24c   :  { %v423_v6 = vmul.f32 %v1972_v0, %v421_v5 }
 0x24e   :  { %425 = vrot.lane.b32.xlu0 %v423_v6, %s2070_s22 }
 0x2c0   :  { %v426_v9 = vpop.permute.xlu0 %425 }
 0x2c1   :  { %v428_v11 = vadd.f32 %v426_v9, %v418_v7 }
 0x2c3   :  { %1973 = vtanh.f32 %v428_v11 }
 0x2cd   :  { %v1974_v12 = vpop.eup %1973 }
 0x2ce   :  { %431 = vrot.lane.b32.xlu1 %v1974_v12, %s2069_s4 }
 0x340   :  { %v432_v13 = vpop.permute.xlu1 %431 }
 0x341   :  { %v434_v14 = vmul.f32 %v1972_v0, %v432_v13 }
 0x343   :  { %436 = vrot.lane.b32.xlu1 %v434_v14, %s2070_s22 }
 0x3b5   :  { %v437_v15 = vpop.permute.xlu1 %436 }
 0x3b6   :  { %439 = vst.msk [vmem:[#allocation2] sm:$0xff] %vm202_vm5, %v437_v15  ;;  %1777 = vmatmul.mubr.msk.f32.vlgmr.msra.gmra.mrb[8].mxu1 %vm202_vm5, %v437_v15 }
 0x3b7   :  { %1919 = vmatpush3.bf16.msra.mxu1 %v2143_v8  ;;  %1798 = vmatprep.mubr.msk.f32.mxu1 %vm2067_vm4, %v2068_v24 }
 0x3b8   :  { %1920 = vmatprep.subr.bf16.mxu1 %v2066_v10 }
 0x3bb   :  { %1922 = vmatpush3.bf16.msra.mxu1 %v2188_v23 }
 0x3bc   :  { %1929 = vmatprep.subr.bf16.mxu1 %v2066_v10 }
 0x489   :  { %v508_v17 = vpop.f32.mrb[8].mxu1 }
 0x48a   :  { %v512_v18 = vadd.f32 %v508_v17, %v299_v16  ;;  %v1778_v19 = vpop.f32.mrb[9].mxu1 }
 0x48c   :  { %v1598_v20 = vmul.f32 -1.442695, %v512_v18  ;;  %v314_v18 = vadd.f32 %v2222_v52, %v2231_v63 }
 0x48e   :  { %1975 = vpow2.f32 %v1598_v20 }
 0x498   :  { %v1976_v21 = vpop.eup %1975 }
 0x499   :  { %v516_v22 = vadd.f32 1.0, %v1976_v21 }
 0x49b   :  { %1977 = vrcp.f32 %v516_v22 }
 0x4a5   :  { %v1978_v25 = vpop.eup %1977 }
 0x4a6   :  { %v519_v26 = vmul.f32 2.0, %v1978_v25  ;;  %v521_v30 = vmul.f32 %v1978_v25, %v428_v11 }
 0x4a8   :  { %v1599_v27 = vadd.f32 -1.0, %v519_v26 }
 0x4aa   :  { %523 = vrot.lane.b32.xlu0 %v1599_v27, %s2069_s4 }
 0x51c   :  { %v524_v28 = vpop.permute.xlu0 %523 }
 0x51d   :  { %v526_v29 = vmul.f32 %v1978_v25, %v524_v28 }
 0x51f   :  { %528 = vrot.lane.b32.xlu1 %v526_v29, %s2070_s22 }
 0x591   :  { %v529_v31 = vpop.permute.xlu1 %528 }
 0x592   :  { %v531_v32 = vadd.f32 %v529_v31, %v521_v30 }
 0x594   :  { %1979 = vtanh.f32 %v531_v32 }
 0x59e   :  { %v1980_v33 = vpop.eup %1979 }
 0x59f   :  { %534 = vrot.lane.b32.xlu0 %v1980_v33, %s2069_s4 }
 0x611   :  { %v535_v34 = vpop.permute.xlu0 %534 }
 0x612   :  { %v537_v35 = vmul.f32 %v1978_v25, %v535_v34 }
 0x614   :  { %539 = vrot.lane.b32.xlu1 %v537_v35, %s2070_s22 }
 0x686   :  { %v540_v36 = vpop.permute.xlu1 %539 }
 0x687   :  { %542 = vst.msk [vmem:[#allocation2 + $0x8] sm:$0xff] %vm202_vm5, %v540_v36  ;;  %1788 = vmatmul.mubr.msk.f32.vlgmr.msra.gmra.mrb[10].mxu0 %vm202_vm5, %v540_v36 }
 0x688   :  { %1925 = vmatpush3.bf16.msra.mxu0 %v2143_v8  ;;  %1809 = vmatprep.mubr.msk.f32.mxu0 %vm2067_vm4, %v2068_v24 }
 0x689   :  { %1926 = vmatprep.subr.bf16.mxu0 %v2066_v10 }
 0x68c   :  { %1928 = vmatpush3.bf16.msra.mxu0 %v2188_v23 }
 0x68d   :  { %1935 = vmatprep.subr.bf16.mxu0 %v2066_v10 }
 0x75a   :  { %v611_v38 = vpop.f32.mrb[10].mxu0 }
 0x75b   :  { %v615_v39 = vadd.f32 %v611_v38, %v304_v37  ;;  %v1789_v40 = vpop.f32.mrb[11].mxu0  ;;  %v319_v38 = vadd.f32 %v2229_v62, %v2222_v52 }
 0x75d   :  { %v1601_v41 = vmul.f32 -1.442695, %v615_v39 }
 0x75f   :  { %1981 = vpow2.f32 %v1601_v41 }
 0x769   :  { %v1982_v42 = vpop.eup %1981 }
 0x76a   :  { %v619_v43 = vadd.f32 1.0, %v1982_v42 }
 0x76c   :  { %1983 = vrcp.f32 %v619_v43 }
 0x776   :  { %v1984_v44 = vpop.eup %1983 }
 0x777   :  { %v622_v45 = vmul.f32 2.0, %v1984_v44  ;;  %v624_v49 = vmul.f32 %v1984_v44, %v531_v32 }
 0x779   :  { %v1602_v46 = vadd.f32 -1.0, %v622_v45 }
 0x77b   :  { %626 = vrot.lane.b32.xlu0 %v1602_v46, %s2069_s4 }
 0x7ed   :  { %v627_v47 = vpop.permute.xlu0 %626 }
 0x7ee   :  { %v629_v48 = vmul.f32 %v1984_v44, %v627_v47 }
 0x7f0   :  { %631 = vrot.lane.b32.xlu1 %v629_v48, %s2070_s22  ;;  %v1169_v48 = vld [vmem:[%s2514_s6] sm:$0xff] }
 0x862   :  { %v632_v50 = vpop.permute.xlu1 %631 }
 0x863   :  { %v634_v51 = vadd.f32 %v632_v50, %v624_v49  ;;  %v1170_v49 = vld [vmem:[%s2514_s6 + $0x8] sm:$0xff] }
 0x864   :  { %v1947_v50 = vpack.c.bf16 %v1170_v49, %v1169_v48 }
 0x865   :  { %1985 = vtanh.f32 %v634_v51 }
 0x86f   :  { %v1986_v53 = vpop.eup %1985 }
 0x870   :  { %637 = vrot.lane.b32.xlu0 %v1986_v53, %s2069_s4 }
 0x8e2   :  { %v638_v54 = vpop.permute.xlu0 %637 }
 0x8e3   :  { %v640_v55 = vmul.f32 %v1984_v44, %v638_v54 }
 0x8e5   :  { %642 = vrot.lane.b32.xlu1 %v640_v55, %s2070_s22  ;;  %v1171_v55 = vld [vmem:[%s2514_s6 + $0x10] sm:$0xff] }
 0x957   :  { %v643_v56 = vpop.permute.xlu1 %642 }
 0x958   :  { %645 = vst.msk [vmem:[#allocation2 + $0x10] sm:$0xff] %vm202_vm5, %v643_v56  ;;  %1799 = vmatmul.mubr.msk.f32.vlgmr.msra.gmra.mrb[10].mxu1 %vm202_vm5, %v643_v56  ;;  %v1172_v56 = vld [vmem:[%s2514_s6 + $0x18] sm:$0xff] }
 0x959   :  { %1931 = vmatpush3.bf16.msra.mxu1 %v2143_v8  ;;  %1820 = vmatprep.mubr.msk.f32.mxu1 %vm2067_vm4, %v2068_v24 }
 0x95a   :  { %1932 = vmatprep.subr.bf16.mxu1 %v2066_v10 }
 0x95d   :  { %1934 = vmatpush3.bf16.msra.mxu1 %v2188_v23 }
 0x95e   :  { %1941 = vmatprep.subr.bf16.mxu1 %v2066_v10 }
 0xa2b   :  { %v714_v58 = vpop.f32.mrb[10].mxu1 }
 0xa2c   :  { %v718_v59 = vadd.f32 %v714_v58, %v309_v57  ;;  %v1800_v61 = vpop.f32.mrb[11].mxu1  ;;  %v1951_v57 = vpack.c.bf16 %v1172_v56, %v1171_v55 }
 0xa2d   :  { %v1162_v61 = vld [vmem:[#allocation2 + $0x8] sm:$0xff] }
 0xa2e   :  { %v1604_v0 = vmul.f32 -1.442695, %v718_v59  ;;  %v1161_v59 = vld [vmem:[#allocation2] sm:$0xff] }
 0xa30   :  { %1987 = vpow2.f32 %v1604_v0  ;;  %v1163_v0 = vld [vmem:[#allocation2 + $0x10] sm:$0xff] }
 0xa3a   :  { %v1988_v1 = vpop.eup %1987 }
 0xa3b   :  { %v722_v2 = vadd.f32 1.0, %v1988_v1 }
 0xa3d   :  { %1989 = vrcp.f32 %v722_v2 }
 0xa47   :  { %v1990_v5 = vpop.eup %1989 }
 0xa48   :  { %v725_v6 = vmul.f32 2.0, %v1990_v5  ;;  %v727_v12 = vmul.f32 %v1990_v5, %v634_v51 }
 0xa4a   :  { %v1605_v7 = vadd.f32 -1.0, %v725_v6  ;;  %v324_v6 = vadd.f32 %v2222_v52, %v2236_v4 }
 0xa4c   :  { %729 = vrot.lane.b32.xlu0 %v1605_v7, %s2069_s4 }
 0xabe   :  { %v730_v9 = vpop.permute.xlu0 %729 }
 0xabf   :  { %v732_v11 = vmul.f32 %v1990_v5, %v730_v9 }
 0xac1   :  { %734 = vrot.lane.b32.xlu1 %v732_v11, %s2070_s22 }
 0xb33   :  { %v735_v13 = vpop.permute.xlu1 %734 }
 0xb34   :  { %v737_v60 = vadd.f32 %v735_v13, %v727_v12 }
 0xb36   :  { %1991 = vtanh.f32 %v737_v60 }
 0xb40   :  { %v1992_v14 = vpop.eup %1991 }
 0xb41   :  { %740 = vrot.lane.b32.xlu0 %v1992_v14, %s2069_s4 }
 0xbb3   :  { %v741_v15 = vpop.permute.xlu0 %740 }
 0xbb4   :  { %v743_v16 = vmul.f32 %v1990_v5, %v741_v15 }
 0xbb6   :  { %745 = vrot.lane.b32.xlu1 %v743_v16, %s2070_s22 }
 0xc28   :  { %v746_v17 = vpop.permute.xlu1 %745 }
 0xc29   :  { %748 = vst.msk [vmem:[#allocation2 + $0x18] sm:$0xff] %vm202_vm5, %v746_v17  ;;  %1810 = vmatmul.mubr.msk.f32.vlgmr.msra.gmra.mrb[12].mxu0 %vm202_vm5, %v746_v17 }
 0xc2a   :  { %1937 = vmatpush3.bf16.msra.mxu0 %v2143_v8  ;;  %1831 = vmatprep.mubr.msk.f32.mxu0 %vm2067_vm4, %v2068_v24 }
 0xc2b   :  { %1938 = vmatprep.subr.bf16.mxu0 %v2066_v10 }
 0xc2e   :  { %1940 = vmatpush3.bf16.msra.mxu0 %v2188_v23 }
 0xc2f   :  { %1948 = vmatprep.subr.bf16.mxu0 %v1947_v50 }
 0xc30   :  { %v1164_v1 = vld [vmem:[#allocation2 + $0x18] sm:$0xff] }
 0xcfc   :  { %v817_v19 = vpop.f32.mrb[12].mxu0 }
 0xcfd   :  { %v821_v20 = vadd.f32 %v817_v19, %v314_v18  ;;  %v1811_v21 = vpop.f32.mrb[13].mxu0 }
 0xcff   :  { %v1607_v22 = vmul.f32 -1.442695, %v821_v20 }
 0xd01   :  { %1993 = vpow2.f32 %v1607_v22 }
 0xd0b   :  { %v1994_v25 = vpop.eup %1993 }
 0xd0c   :  { %v825_v26 = vadd.f32 1.0, %v1994_v25 }
 0xd0e   :  { %1995 = vrcp.f32 %v825_v26 }
 0xd18   :  { %v1996_v27 = vpop.eup %1995 }
 0xd19   :  { %v828_v28 = vmul.f32 2.0, %v1996_v27  ;;  %v830_v32 = vmul.f32 %v1996_v27, %v737_v60 }
 0xd1b   :  { %v1608_v29 = vadd.f32 -1.0, %v828_v28 }
 0xd1d   :  { %832 = vrot.lane.b32.xlu0 %v1608_v29, %s2069_s4 }
 0xd8f   :  { %v833_v30 = vpop.permute.xlu0 %832 }
 0xd90   :  { %v835_v31 = vmul.f32 %v1996_v27, %v833_v30 }
 0xd92   :  { %837 = vrot.lane.b32.xlu1 %v835_v31, %s2070_s22 }
 0xe04   :  { %v838_v33 = vpop.permute.xlu1 %837 }
 0xe05   :  { %v840_v63 = vadd.f32 %v838_v33, %v830_v32 }
 0xe07   :  { %1997 = vtanh.f32 %v840_v63 }
 0xe11   :  { %v1998_v34 = vpop.eup %1997 }
 0xe12   :  { %843 = vrot.lane.b32.xlu0 %v1998_v34, %s2069_s4 }
 0xe84   :  { %v844_v35 = vpop.permute.xlu0 %843 }
 0xe85   :  { %v846_v36 = vmul.f32 %v1996_v27, %v844_v35 }
 0xe87   :  { %848 = vrot.lane.b32.xlu1 %v846_v36, %s2070_s22 }
 0xef9   :  { %v849_v37 = vpop.permute.xlu1 %848 }
 0xefa   :  { %851 = vst.msk [vmem:[#allocation2 + $0x20] sm:$0xff] %vm202_vm5, %v849_v37  ;;  %1821 = vmatmul.mubr.msk.f32.vlgmr.msra.gmra.mrb[12].mxu1 %vm202_vm5, %v849_v37 }
 0xefb   :  { %1943 = vmatpush3.bf16.msra.mxu1 %v2143_v8  ;;  %1842 = vmatprep.mubr.msk.f32.mxu1 %vm2067_vm4, %v2068_v24 }
 0xefc   :  { %1944 = vmatprep.subr.bf16.mxu1 %v2066_v10 }
 0xeff   :  { %1946 = vmatpush3.bf16.msra.mxu1 %v2188_v23 }
 0xf01   :  { %v1165_v2 = vld [vmem:[#allocation2 + $0x20] sm:$0xff] }
 0xfcd   :  { %v920_v39 = vpop.f32.mrb[12].mxu1 }
 0xfce   :  { %v924_v40 = vadd.f32 %v920_v39, %v319_v38  ;;  %v1822_v41 = vpop.f32.mrb[13].mxu1 }
 0xfd0   :  { %v1610_v42 = vmul.f32 -1.442695, %v924_v40 }
 0xfd2   :  { %1999 = vpow2.f32 %v1610_v42 }
 0xfdc   :  { %v2000_v43 = vpop.eup %1999 }
 0xfdd   :  { %v928_v44 = vadd.f32 1.0, %v2000_v43 }
 0xfdf   :  { %2001 = vrcp.f32 %v928_v44 }
 0xfe9   :  { %v2002_v45 = vpop.eup %2001 }
 0xfea   :  { %v931_v8 = vmul.f32 2.0, %v2002_v45  ;;  %v933_v23 = vmul.f32 %v2002_v45, %v840_v63  ;;  %v329_v63 = vadd.f32 %v2234_v3, %v2222_v52 }
 0xfec   :  { %v1611_v46 = vadd.f32 -1.0, %v931_v8 }
 0xfee   :  { %935 = vrot.lane.b32.xlu0 %v1611_v46, %s2069_s4  ;;  %v2349_v46 = vld [vmem:[%s2515_s7] ss:$0 sm:$0xff] }
0x1060   :  { %v936_v24 = vpop.permute.xlu0 %935 }
0x1061   :  { %v938_v10 = vmul.f32 %v2002_v45, %v936_v24 }
0x1063   :  { %940 = vrot.lane.b32.xlu1 %v938_v10, %s2070_s22 }
0x10d5   :  { %v941_v47 = vpop.permute.xlu1 %940 }
0x10d6   :  { %v943_v62 = vadd.f32 %v941_v47, %v933_v23 }
0x10d8   :  { %2003 = vtanh.f32 %v943_v62 }
0x10e2   :  { %v2004_v51 = vpop.eup %2003 }
0x10e3   :  { %946 = vrot.lane.b32.xlu0 %v2004_v51, %s2069_s4 }
0x1155   :  { %v947_v53 = vpop.permute.xlu0 %946 }
0x1156   :  { %v949_v54 = vmul.f32 %v2002_v45, %v947_v53 }
0x1158   :  { %951 = vrot.lane.b32.xlu1 %v949_v54, %s2070_s22 }
0x11ca   :  { %v952_v58 = vpop.permute.xlu1 %951 }
0x11cb   :  { %954 = vst.msk [vmem:[#allocation2 + $0x28] sm:$0xff] %vm202_vm5, %v952_v58  ;;  %1832 = vmatmul.mubr.msk.f32.vlgmr.msra.gmra.mrb[14].mxu0 %vm202_vm5, %v952_v58 }
0x11cc   :  { %1950 = vmatpush3.bf16.msra.mxu0 %v1947_v50  ;;  %1853 = vmatprep.mubr.msk.f32.mxu0 %vm202_vm5, %v1161_v59 }
0x11cd   :  { %1952 = vmatprep.subr.bf16.mxu0 %v1951_v57 }
0x11d0   :  { %1954 = vmatpush3.bf16.msra.mxu0 %v1951_v57 }
0x11d2   :  { %v1166_v5 = vld [vmem:[#allocation2 + $0x28] sm:$0xff] }
0x11d3   :  { %1854 = vmatmul.mubr.msk.f32.vlgmr.msra.gmra.mrb[16].mxu0 %vm202_vm5, %v1162_v61  ;;  %v1357_v61 = vld [vmem:[%s2516_s8] sm:$0xff] }
0x11d4   :  { %1856 = vmatprep.mubr.msk.f32.mxu0 %vm202_vm5, %v1163_v0  ;;  %v1358_v0 = vld [vmem:[%s2516_s8 + $0x8] sm:$0xff] }
0x11d7   :  { %1857 = vmatmul.mubr.msk.f32.gmra.mrb[18].mxu0 %vm202_vm5, %v1164_v1  ;;  %v1955_v1 = vpack.c.bf16 %v1358_v0, %v1357_v61 }
0x11d8   :  { %1859 = vmatprep.mubr.msk.f32.mxu0 %vm202_vm5, %v1165_v2 }
0x11d9   :  { %1956 = vmatprep.subr.bf16.mxu1 %v1955_v1 }
0x11db   :  { %1860 = vmatmul.mubr.msk.f32.gmra.mrb[20].mxu0 %vm202_vm5, %v1166_v5  ;;  %v1359_v5 = vld [vmem:[%s2516_s8 + $0x10] sm:$0xff] }
0x129e   :  { %v1023_v7 = vpop.f32.mrb[14].mxu0 }
0x129f   :  { %v1027_v9 = vadd.f32 %v1023_v7, %v324_v6  ;;  %v1833_v11 = vpop.f32.mrb[15].mxu0  ;;  %v1360_v6 = vld [vmem:[%s2516_s8 + $0x18] sm:$0xff] }
0x12a0   :  { %v1959_v7 = vpack.c.bf16 %v1360_v6, %v1359_v5 }
0x12a1   :  { %v1613_v12 = vmul.f32 -1.442695, %v1027_v9 }
0x12a3   :  { %2005 = vpow2.f32 %v1613_v12 }
0x12a6   :  { %v2330_v13 = vpop.f32.mrb[16].mxu0 }
0x12a7   :  { %v1270_v60 = vpop.f32.mrb[17].mxu0  ;;  %v2374_v54 = vadd.f32 %v2330_v13, %v2349_v46 }
0x12a8   :  { %v2352_v24 = vadd.f32 %v2349_v46, %v1270_v60 }
0x12a9   :  { %v1312_v56 = vsel %vm202_vm5, %v2374_v54, -inf }
0x12aa   :  { %v1858_v14 = vpop.f32.mrb[18].mxu0  ;;  %v1309_v23 = vsel %vm202_vm5, %v2352_v24, -inf }
0x12ab   :  { %v1280_v15 = vpop.f32.mrb[19].mxu0  ;;  %v2360_v47 = vadd.f32 %v1858_v14, %v2349_v46 }
0x12ac   :  { %v2355_v10 = vadd.f32 %v2349_v46, %v1280_v15 }
0x12ad   :  { %v2006_v16 = vpop.eup %2005  ;;  %v1318_v49 = vsel %vm202_vm5, %v2360_v47, -inf }
0x12ae   :  { %v1031_v17 = vadd.f32 1.0, %v2006_v16  ;;  %v1861_v18 = vpop.f32.mrb[20].mxu0 }
0x12af   :  { %v2332_v19 = vpop.f32.mrb[21].mxu0  ;;  %v2365_v48 = vadd.f32 %v1861_v18, %v2349_v46 }
0x12b0   :  { %2007 = vrcp.f32 %v1031_v17  ;;  %v2378_v55 = vadd.f32 %v2349_v46, %v2332_v19 }
0x12b1   :  { %v1324_v50 = vsel %vm202_vm5, %v2365_v48, -inf }
0x12b2   :  { %v1321_v57 = vsel %vm202_vm5, %v2378_v55, -inf }
0x12ba   :  { %v2008_v20 = vpop.eup %2007 }
0x12bb   :  { %v1034_v21 = vmul.f32 2.0, %v2008_v20  ;;  %v1036_v26 = vmul.f32 %v2008_v20, %v943_v62  ;;  %v1315_v62 = vsel %vm202_vm5, %v2355_v10, -inf }
0x12bd   :  { %v1614_v22 = vadd.f32 -1.0, %v1034_v21 }
0x12bf   :  { %1038 = vrot.lane.b32.xlu0 %v1614_v22, %s2069_s4 }
0x1331   :  { %v1039_v4 = vpop.permute.xlu0 %1038 }
0x1332   :  { %v1041_v25 = vmul.f32 %v2008_v20, %v1039_v4 }
0x1334   :  { %1043 = vrot.lane.b32.xlu1 %v1041_v25, %s2070_s22 }
0x13a6   :  { %v1044_v27 = vpop.permute.xlu1 %1043 }
0x13a7   :  { %v1046_v28 = vadd.f32 %v1044_v27, %v1036_v26 }
0x13a9   :  { %2009 = vtanh.f32 %v1046_v28 }
0x13b3   :  { %v2010_v29 = vpop.eup %2009 }
0x13b4   :  { %1049 = vrot.lane.b32.xlu0 %v2010_v29, %s2069_s4 }
0x1426   :  { %v1050_v30 = vpop.permute.xlu0 %1049 }
0x1427   :  { %v1052_v31 = vmul.f32 %v2008_v20, %v1050_v30 }
0x1429   :  { %1054 = vrot.lane.b32.xlu1 %v1052_v31, %s2070_s22 }
0x149b   :  { %v1055_v32 = vpop.permute.xlu1 %1054 }
0x149c   :  { %1057 = vst.msk [vmem:[#allocation2 + $0x30] sm:$0xff] %vm202_vm5, %v1055_v32  ;;  %1843 = vmatmul.mubr.msk.f32.vlgmr.msra.gmra.mrb[14].mxu1 %vm202_vm5, %v1055_v32 }
0x149d   :  { %1958 = vmatpush3.bf16.msra.mxu1 %v1955_v1 }
0x149e   :  { %1960 = vmatprep.subr.bf16.mxu1 %v1959_v7 }
0x14a1   :  { %1962 = vmatpush3.bf16.msra.mxu1 %v1959_v7 }
0x14a3   :  { %v1167_v33 = vld [vmem:[#allocation2 + $0x30] sm:$0xff] }
0x14a4   :  { %1862 = vmatprep.mubr.msk.f32.mxu0 %vm202_vm5, %v1167_v33 }
0x156f   :  { %v1126_v34 = vpop.f32.mrb[14].mxu1 }
0x1570   :  { %v1130_v35 = vadd.f32 %v1126_v34, %v329_v63  ;;  %v1844_v36 = vpop.f32.mrb[15].mxu1 }
0x1572   :  { %v1616_v37 = vmul.f32 -1.442695, %v1130_v35 }
0x1574   :  { %2011 = vpow2.f32 %v1616_v37 }
0x157e   :  { %v2012_v38 = vpop.eup %2011 }
0x157f   :  { %v1134_v39 = vadd.f32 1.0, %v2012_v38  ;;  %v1516_v38 = vmul.f32 1.442695, %v2374_v54 }
0x1581   :  { %2013 = vrcp.f32 %v1134_v39  ;;  %v1514_v39 = vmul.f32 1.442695, %v2352_v24 }
0x158b   :  { %v2014_v40 = vpop.eup %2013 }
0x158c   :  { %v1137_v41 = vmul.f32 2.0, %v2014_v40  ;;  %v1139_v45 = vmul.f32 %v2014_v40, %v1046_v28 }
0x158e   :  { %v1617_v42 = vadd.f32 -1.0, %v1137_v41  ;;  %v1520_v41 = vmul.f32 1.442695, %v2360_v47 }
0x1590   :  { %1141 = vrot.lane.b32.xlu0 %v1617_v42, %s2069_s4 }
0x1602   :  { %v1142_v43 = vpop.permute.xlu0 %1141 }
0x1603   :  { %v1144_v44 = vmul.f32 %v2014_v40, %v1142_v43 }
0x1605   :  { %1146 = vrot.lane.b32.xlu1 %v1144_v44, %s2070_s22  ;;  %v1518_v44 = vmul.f32 1.442695, %v2355_v10 }
0x1677   :  { %v1147_v8 = vpop.permute.xlu1 %1146 }
0x1678   :  { %v1149_v52 = vadd.f32 %v1147_v8, %v1139_v45 }
0x167a   :  { %2015 = vtanh.f32 %v1149_v52  ;;  %v1524_v52 = vmul.f32 1.442695, %v2365_v48 }
0x1684   :  { %v2016_v3 = vpop.eup %2015 }
0x1685   :  { %1152 = vrot.lane.b32.xlu0 %v2016_v3, %s2069_s4 }
0x16a4   :  { %1310 = vmax.xlane.f32.xlu0 %v1309_v23  ;;  %v1522_v23 = vmul.f32 1.442695, %v2378_v55 }
0x16a8   :  { %1316 = vmax.xlane.f32.xlu0 %v1315_v62 }
0x16ac   :  { %1319 = vmax.xlane.f32.xlu0 %v1318_v49 }
0x16b0   :  { %1325 = vmax.xlane.f32.xlu0 %v1324_v50 }
0x16f7   :  { %v1153_v51 = vpop.permute.xlu0 %1152 }
0x16f8   :  { %v1155_v53 = vmul.f32 %v2014_v40, %v1153_v51 }
0x16fa   :  { %1157 = vrot.lane.b32.xlu1 %v1155_v53, %s2070_s22 }
0x171e   :  { %1313 = vmax.xlane.f32.xlu1 %v1312_v56 }
0x1722   :  { %1322 = vmax.xlane.f32.xlu1 %v1321_v57 }
0x1731   :  { %v1311_v58 = vpop.xlane.xlu0 %1310 }
0x1732   :  { %v1333_v59 = vsub.f32 %v2352_v24, %v1311_v58 }
0x1734   :  { %v1341_v2 = vmul.f32 1.442695, %v1333_v59 }
0x1735   :  { %v1317_v13 = vpop.xlane.xlu0 %1316 }
0x1736   :  { %2017 = vpow2.f32 %v1341_v2  ;;  %v1335_v14 = vsub.f32 %v2355_v10, %v1317_v13 }
0x1738   :  { %v1345_v18 = vmul.f32 1.442695, %v1335_v14 }
0x1739   :  { %v1320_v60 = vpop.xlane.xlu0 %1319 }
0x173a   :  { %v1336_v15 = vsub.f32 %v2360_v47, %v1320_v60 }
0x173c   :  { %v1347_v21 = vmul.f32 1.442695, %v1336_v15 }
0x173d   :  { %v1326_v19 = vpop.xlane.xlu0 %1325 }
0x173e   :  { %v1338_v4 = vsub.f32 %v2365_v48, %v1326_v19 }
0x1740   :  { %v2397_v9 = vpop.eup %2017  ;;  %v1351_v27 = vmul.f32 1.442695, %v1338_v4 }
0x1741   :  { %1873 = vmatprep.mubr.msk.f32.mxu1 %vm202_vm5, %v2397_v9 }
0x176c   :  { %v1158_v11 = vpop.permute.xlu1 %1157 }
0x176d   :  { %1160 = vst.msk [vmem:[#allocation2 + $0x38] sm:$0xff] %vm202_vm5, %v1158_v11 }
0x1774   :  { %v1168_v12 = vld [vmem:[#allocation2 + $0x38] sm:$0xff] }
0x1775   :  { %1863 = vmatmul.mubr.msk.f32.gmra.mrb[22].mxu0 %vm202_vm5, %v1168_v12 }
0x17ab   :  { %v1314_v16 = vpop.xlane.xlu1 %1313 }
0x17ac   :  { %v1334_v17 = vsub.f32 %v2374_v54, %v1314_v16 }
0x17ae   :  { %v1343_v20 = vmul.f32 1.442695, %v1334_v17 }
0x17af   :  { %v1323_v22 = vpop.xlane.xlu1 %1322 }
0x17b0   :  { %2019 = vpow2.f32 %v1343_v20  ;;  %v1337_v25 = vsub.f32 %v2378_v55, %v1323_v22 }
0x17b1   :  { %2021 = vpow2.f32 %v1345_v18 }
0x17b2   :  { %v1349_v26 = vmul.f32 1.442695, %v1337_v25  ;;  %2023 = vpow2.f32 %v1347_v21 }
0x17b4   :  { %2025 = vpow2.f32 %v1349_v26 }
0x17b5   :  { %2027 = vpow2.f32 %v1351_v27 }
0x17b6   :  { %2029 = vpow2.f32 %v1516_v38 }
0x17b7   :  { %2031 = vpow2.f32 %v1514_v39 }
0x17ba   :  { %v2020_v28 = vpop.eup %2019 }
0x17bb   :  { %v2408_v29 = vpop.eup %2021  ;;  %1874 = vmatmul.mubr.msk.f32.vlgmr.msra.gmra.mrb[16].mxu1 %vm202_vm5, %v2020_v28 }
0x17bc   :  { %1876 = vmatprep.mubr.msk.f32.mxu1 %vm202_vm5, %v2408_v29  ;;  %v2413_v30 = vpop.eup %2023 }
0x17be   :  { %v2415_v31 = vpop.eup %2025 }
0x17bf   :  { %1877 = vmatmul.mubr.msk.f32.gmra.mrb[18].mxu1 %vm202_vm5, %v2413_v30  ;;  %v2421_v32 = vpop.eup %2027 }
0x17c0   :  { %1879 = vmatprep.mubr.msk.f32.mxu1 %vm202_vm5, %v2415_v31  ;;  %v2030_v56 = vpop.eup %2029 }
0x17c1   :  { %v2032_v57 = vpop.eup %2031  ;;  %v1531_v1 = vmul.f32 1.0723805, %v2030_v56 }
0x17c2   :  { %v1530_v6 = vmul.f32 1.0723805, %v2032_v57 }
0x17c3   :  { %1880 = vmatmul.mubr.msk.f32.gmra.mrb[20].mxu1 %vm202_vm5, %v2421_v32 }
0x1848   :  { %v1864_v33 = vpop.f32.mrb[22].mxu0 }
0x1849   :  { %v2426_v63 = vadd.f32 %v1864_v33, %v2349_v46  ;;  %v1300_v34 = vpop.f32.mrb[23].mxu0 }
0x184a   :  { %v2429_v35 = vadd.f32 %v2349_v46, %v1300_v34 }
0x184b   :  { %v1330_v36 = vsel %vm202_vm5, %v2426_v63, -inf }
0x184c   :  { %1331 = vmax.xlane.f32.xlu0 %v1330_v36  ;;  %v1327_v37 = vsel %vm202_vm5, %v2429_v35, -inf }
0x184d   :  { %1328 = vmax.xlane.f32.xlu1 %v1327_v37 }
0x188e   :  { %v1875_v40 = vpop.f32.mrb[16].mxu1 }
0x188f   :  { %v1491_v42 = vmul.f32 1.15, %v1875_v40  ;;  %v1451_v43 = vpop.f32.mrb[17].mxu1 }
0x1890   :  { %v1490_v45 = vmul.f32 1.15, %v1451_v43 }
0x1891   :  { %2033 = vrcp.f32 %v1491_v42 }
0x1892   :  { %2035 = vrcp.f32 %v1490_v45  ;;  %v1878_v8 = vpop.f32.mrb[18].mxu1  ;;  %v1526_v45 = vmul.f32 1.442695, %v2429_v35 }
0x1893   :  { %2037 = vpow2.f32 %v1520_v41  ;;  %v1493_v3 = vmul.f32 1.15, %v1878_v8  ;;  %v1461_v46 = vpop.f32.mrb[19].mxu1 }
0x1894   :  { %2039 = vpow2.f32 %v1518_v44  ;;  %v1492_v62 = vmul.f32 1.15, %v1461_v46  ;;  %v1528_v44 = vmul.f32 1.442695, %v2426_v63 }
0x1895   :  { %2041 = vrcp.f32 %v1493_v3 }
0x1896   :  { %2043 = vrcp.f32 %v1492_v62  ;;  %v1881_v49 = vpop.f32.mrb[20].mxu1 }
0x1897   :  { %2045 = vpow2.f32 %v1524_v52  ;;  %v1495_v50 = vmul.f32 1.15, %v1881_v49  ;;  %v1471_v51 = vpop.f32.mrb[21].mxu1 }
0x1898   :  { %2047 = vpow2.f32 %v1522_v23  ;;  %v1494_v53 = vmul.f32 1.15, %v1471_v51 }
0x1899   :  { %2049 = vrcp.f32 %v1495_v50 }
0x189a   :  { %2051 = vrcp.f32 %v1494_v53 }
0x189b   :  { %v2034_v58 = vpop.eup %2033 }
0x189c   :  { %v2036_v59 = vpop.eup %2035  ;;  %v1507_v61 = vmul.f32 %v2034_v58, %v2020_v28 }
0x189d   :  { %v2038_v0 = vpop.eup %2037  ;;  %v1506_v2 = vmul.f32 %v2036_v59, %v2397_v9 }
0x189e   :  { %v2040_v5 = vpop.eup %2039  ;;  %v1539_v7 = vsel %vm202_vm5, %v1507_v61, %v2374_v54  ;;  %v1533_v9 = vmul.f32 1.0723805, %v2038_v0 }
0x189f   :  { %v2042_v11 = vpop.eup %2041  ;;  %v1548_v12 = vsel %vm1546_vm6, %v1539_v7, %v1531_v1  ;;  %v1538_v13 = vsel %vm202_vm5, %v1506_v2, %v2352_v24  ;;  %v1532_v20 = vmul.f32 1.0723805, %v2040_v5 }
0x18a0   :  { %v2044_v60 = vpop.eup %2043  ;;  %v1557_v14 = vsel %vm1555_vm7, %v1548_v12, 0.0  ;;  %v1547_v15 = vsel %vm1546_vm6, %v1538_v13, %v1530_v6  ;;  %v1509_v16 = vmul.f32 %v2042_v11, %v2413_v30 }
0x18a1   :  { %v2046_v17 = vpop.eup %2045  ;;  %1565 = vst [vmem:[%s2517_s9 + $0x8] sm:$0xff] %v1557_v14  ;;  %v1556_v54 = vsel %vm1555_vm7, %v1547_v15, 0.0  ;;  %v1508_v18 = vmul.f32 %v2044_v60, %v2408_v29 }
0x18a2   :  { %v2048_v19 = vpop.eup %2047  ;;  %1564 = vst [vmem:[%s2517_s9] sm:$0xff] %v1556_v54  ;;  %v1541_v24 = vsel %vm202_vm5, %v1509_v16, %v2360_v47  ;;  %v1535_v29 = vmul.f32 1.0723805, %v2046_v17 }
0x18a3   :  { %v2050_v21 = vpop.eup %2049  ;;  %v1550_v22 = vsel %vm1546_vm6, %v1541_v24, %v1533_v9  ;;  %v1540_v4 = vsel %vm202_vm5, %v1508_v18, %v2355_v10  ;;  %v1534_v33 = vmul.f32 1.0723805, %v2048_v19 }
0x18a4   :  { %v2052_v25 = vpop.eup %2051  ;;  %v1559_v26 = vsel %vm1555_vm7, %v1550_v22, 0.0  ;;  %v1549_v27 = vsel %vm1546_vm6, %v1540_v4, %v1532_v20  ;;  %v1511_v28 = vmul.f32 %v2050_v21, %v2421_v32 }
0x18a5   :  { %1567 = vst [vmem:[%s2517_s9 + $0x18] sm:$0xff] %v1559_v26  ;;  %v1558_v47 = vsel %vm1555_vm7, %v1549_v27, 0.0  ;;  %v1510_v30 = vmul.f32 %v2052_v25, %v2415_v31 }
0x18a6   :  { %1566 = vst [vmem:[%s2517_s9 + $0x10] sm:$0xff] %v1558_v47  ;;  %v1543_v10 = vsel %vm202_vm5, %v1511_v28, %v2365_v48 }
0x18a7   :  { %v1552_v34 = vsel %vm1546_vm6, %v1543_v10, %v1535_v29  ;;  %v1542_v32 = vsel %vm202_vm5, %v1510_v30, %v2378_v55 }
0x18a8   :  { %v1561_v36 = vsel %vm1555_vm7, %v1552_v34, 0.0  ;;  %v1551_v37 = vsel %vm1546_vm6, %v1542_v32, %v1534_v33 }
0x18a9   :  { %1569 = vst [vmem:[%s2517_s9 + $0x28] sm:$0xff] %v1561_v36  ;;  %v1560_v31 = vsel %vm1555_vm7, %v1551_v37, 0.0 }
0x18aa   :  { %1568 = vst [vmem:[%s2517_s9 + $0x20] sm:$0xff] %v1560_v31 }
0x18d9   :  { %v1332_v48 = vpop.xlane.xlu0 %1331 }
0x18da   :  { %v1340_v38 = vsub.f32 %v2426_v63, %v1332_v48  ;;  %v1329_v39 = vpop.xlane.xlu1 %1328 }
0x18db   :  { %v1339_v55 = vsub.f32 %v2429_v35, %v1329_v39 }
0x18dc   :  { %v1355_v40 = vmul.f32 1.442695, %v1340_v38 }
0x18dd   :  { %v1353_v41 = vmul.f32 1.442695, %v1339_v55 }
0x18df   :  { %2053 = vpow2.f32 %v1353_v41 }
0x18e0   :  { %2055 = vpow2.f32 %v1355_v40 }
0x18e1   :  { %2057 = vpow2.f32 %v1528_v44 }
0x18e2   :  { %2059 = vpow2.f32 %v1526_v45 }
0x18e9   :  { %v2054_v42 = vpop.eup %2053 }
0x18ea   :  { %v2056_v43 = vpop.eup %2055  ;;  %1882 = vmatprep.mubr.msk.f32.mxu1 %vm202_vm5, %v2054_v42 }
0x18eb   :  { %1883 = vmatmul.mubr.msk.f32.gmra.mrb[22].mxu1 %vm202_vm5, %v2056_v43  ;;  %v2058_v23 = vpop.eup %2057 }
0x18ec   :  { %v2060_v62 = vpop.eup %2059  ;;  %v1537_v53 = vmul.f32 1.0723805, %v2058_v23 }
0x18ed   :  { %v1536_v57 = vmul.f32 1.0723805, %v2060_v62 }
0x19be   :  { %v1884_v8 = vpop.f32.mrb[22].mxu1 }
0x19bf   :  { %v1497_v52 = vmul.f32 1.15, %v1884_v8  ;;  %v1481_v3 = vpop.f32.mrb[23].mxu1 }
0x19c0   :  { %v1496_v46 = vmul.f32 1.15, %v1481_v3 }
0x19c1   :  { %2061 = vrcp.f32 %v1497_v52 }
0x19c2   :  { %2063 = vrcp.f32 %v1496_v46 }
0x19cb   :  { %v2062_v49 = vpop.eup %2061 }
0x19cc   :  { %v2064_v50 = vpop.eup %2063  ;;  %v1513_v51 = vmul.f32 %v2062_v49, %v2056_v43 }
0x19cd   :  { %v1512_v56 = vmul.f32 %v2064_v50, %v2054_v42 }
0x19ce   :  { %v1545_v58 = vsel %vm202_vm5, %v1513_v51, %v2426_v63 }
0x19cf   :  { %v1554_v59 = vsel %vm1546_vm6, %v1545_v58, %v1537_v53  ;;  %v1544_v61 = vsel %vm202_vm5, %v1512_v56, %v2429_v35 }
0x19d0   :  { %v1563_v0 = vsel %vm1555_vm7, %v1554_v59, 0.0  ;;  %v1553_v1 = vsel %vm1546_vm6, %v1544_v61, %v1536_v57 }
0x19d1   :  { %1571 = vst [vmem:[%s2517_s9 + $0x38] sm:$0xff] %v1563_v0  ;;  %v1562_v2 = vsel %vm1555_vm7, %v1553_v1, 0.0 }
0x19d2   :  { %1570 = vst [vmem:[%s2517_s9 + $0x30] sm:$0xff] %v1562_v2 }

</bundles_post_ra>
